<compile_context>
chip_gen: v6e
topology: v6e:2x2x1
jax: 0.10.0
libtpu: 0.0.40
codegen_flags: <defaults>
</compile_context>

<pallas_src>
import functools

import jax
import jax.numpy as jnp
from jax import lax
from jax.experimental import pallas as pl
from jax.experimental.pallas import tpu as pltpu


def _nonlocal_kernel(*refs, fold_theta, mxu_dtype):
    """One (batch, query-tile) grid step. All tensors channel-major / lane-dense.

    fold_theta=True  refs: x(C,TN) key(C,M)  g(IC,M) wW(C,IC) scale(C,1) shift(C,1) out(C,TN)
    fold_theta=False refs: x(C,TN) phi(IC,M) g(IC,M) wth(IC,C) wW(C,IC) scale shift out
    """
    if fold_theta:
        x_ref, key_ref, g_ref, ww_ref, scale_ref, shift_ref, o_ref = refs
    else:
        x_ref, key_ref, g_ref, wth_ref, ww_ref, scale_ref, shift_ref, o_ref = refs

    x = x_ref[...]                                                   # (C, TN) f32

    if fold_theta:
        # theta projection already folded into the key in the wrapper.
        q = x.astype(mxu_dtype)                                      # (C, TN)
    else:
        theta = jnp.dot(wth_ref[...], x, preferred_element_type=jnp.float32)
        q = theta.astype(mxu_dtype)                                  # (IC, TN)

    # ft[m, n] = sum_k key[k, m] * q[k, n] — both operands channel-major, tokens on the
    # lane axis, contraction on dim 0 of both (no in-kernel relayout).
    ft = lax.dot_general(key_ref[...], q,
                         dimension_numbers=(((0,), (0,)), ((), ())),
                         preferred_element_type=jnp.float32)         # (M, TN)

    # Softmax over the key axis (axis 0); normalization deferred past the PV matmul.
    m = jnp.max(ft, axis=0, keepdims=True)                           # (1, TN)
    p = jnp.exp(ft - m)                                              # (M, TN) f32
    l = jnp.sum(p, axis=0, keepdims=True)                            # (1, TN)

    # fxy = g @ p: (IC, M) @ (M, TN) -> (IC, TN), then one IC*TN multiply by 1/l
    # (EUP reciprocal) instead of an M*TN VPU divide.
    # TODO(synk): on v7x the PV matmul could take fp8(e4m3) probabilities for ~2x MXU rate.
    fxy = jnp.dot(g_ref[...], p.astype(mxu_dtype),
                  preferred_element_type=jnp.float32)
    fxy = fxy * pl.reciprocal(l, approx=(mxu_dtype != jnp.float32))

    # W(fxy): (C, IC) @ (IC, TN) -> (C, TN); folded BN affine + residual (addition).
    wxy = jnp.dot(ww_ref[...], fxy, preferred_element_type=jnp.float32)
    o_ref[...] = (wxy * scale_ref[...] + shift_ref[...] + x).astype(o_ref.dtype)


def _round_up(v, m):
    return -(-v // m) * m


def _tile_bytes(rows, cols, itemsize):
    # Pad to the (8, 128) vreg tile before counting bytes.
    return _round_up(max(rows, 1), 8) * _round_up(max(cols, 1), 128) * itemsize


def _step_vmem_bytes(C, IC, key_rows, M, tn, mxu_bytes, fold_theta):
    """Rough per-step VMEM footprint (tiles, resident operands and intermediates)."""
    b = 2 * 2 * _tile_bytes(C, tn, 4)                     # x + out tiles, double-buffered
    b += _tile_bytes(key_rows, M, mxu_bytes)              # key   (single-buffered, resident)
    b += _tile_bytes(IC, M, mxu_bytes)                    # value (single-buffered, resident)
    if not fold_theta:
        b += 2 * _tile_bytes(IC, C, 4)                    # w_theta
    b += 2 * _tile_bytes(C, IC, 4) + 4 * _tile_bytes(C, 1, 4)   # w_W, bn scale/shift
    # in-flight intermediates: ft + p (f32), p cast, q cast, fxy, wxy
    b += 2 * _tile_bytes(M, tn, 4) + _tile_bytes(M, tn, mxu_bytes)
    b += _tile_bytes(max(C, IC), tn, mxu_bytes) + _tile_bytes(IC, tn, 4) + _tile_bytes(C, tn, 4)
    return b


def nonlocal_block(x, y, w_theta, w_phi, w_g, w_W, bn_scale, bn_shift,
                   *, tn=None, mxu_dtype=jnp.bfloat16, tn_cap=2048):
    """x, y: NCHW float32. Returns z in NCHW."""
    B, C, H, W = x.shape
    IC = w_theta.shape[0]
    assert H % 2 == 0 and W % 2 == 0
    N = H * W
    Hp, Wp = H // 2, W // 2
    M = Hp * Wp

    mxu_bytes = jnp.dtype(mxu_dtype).itemsize

    # Fold theta into phi whenever C fits a single MXU contraction pass on every chip.
    fold_theta = C <= 128
    key_rows = C if fold_theta else IC

    # --- VMEM budget + query-tile selection -------------------------------------------
    try:
        info = pltpu.get_tpu_info()
        vmem_cap = int(getattr(info, "vmem_capacity_bytes", 128 * 1024 * 1024))
    except Exception:
        vmem_cap = 128 * 1024 * 1024
    # 64 MiB is a comfortable half of v5e/v6e's 128 MiB; on v7x (64 MiB physical per TC)
    # leave 16 MiB headroom for compiler scratch / semaphores.
    vmem_budget = max(min(vmem_cap - 16 * 1024 * 1024, 64 * 1024 * 1024), 32 * 1024 * 1024)

    if tn is None:
        cands = [t for t in range(min(N, tn_cap), 0, -1)
                 if N % t == 0 and (t % 128 == 0 or t == N)]
        if not cands:
            cands = [t for t in range(min(N, tn_cap), 0, -1) if N % t == 0]
        tn = cands[-1]
        for t in cands:
            if _step_vmem_bytes(C, IC, key_rows, M, t, mxu_bytes,
                                fold_theta) <= int(0.75 * vmem_budget):
                tn = t
                break
    assert N % tn == 0, "token count must be divisible by the query tile"
    # TODO(synk): no masked tail path — H*W must be divisible by the chosen query tile.

    # x / out stay channel-major: NCHW -> (B, C, N) is a pure reshape (no transpose).
    x_cn = x.reshape(B, C, N)

    # Fused phi/g projection: one 1x1 conv over y with stacked weights, one 2x2 maxpool,
    # then split — halves HBM reads of y vs. two separate projections.
    w_pg = jnp.concatenate([w_phi, w_g], axis=0)                    # (2*IC, C)
    pg = jnp.einsum('bchw,kc->bkhw', y, w_pg)                       # (B, 2IC, H, W)
    pg = pg.reshape(B, 2 * IC, Hp, 2, Wp, 2).max(axis=(3, 5))       # (B, 2IC, Hp, Wp)
    pg = pg.reshape(B, 2 * IC, M)
    phi_ck = pg[:, :IC]                                             # (B, IC, M) channel-major
    g_ck = pg[:, IC:]                                               # (B, IC, M) channel-major

    if fold_theta:
        # ft = phi^T (Wth x) = (Wth^T phi)^T x : fold the theta projection into the key.
        key = jnp.einsum('ic,bim->bcm', w_theta, phi_ck,
                         precision=lax.Precision.HIGHEST)           # (B, C, M)
    else:
        key = phi_ck                                                # (B, IC, M)

    # Cast the resident operands to the MXU dtype once, in HBM (halves DMA + residency
    # and removes the per-step casts the kernel used to do).
    key = key.astype(mxu_dtype)
    g_ck = g_ck.astype(mxu_dtype)

    scale2 = bn_scale.reshape(C, 1)
    shift2 = bn_shift.reshape(C, 1)

    kernel = functools.partial(_nonlocal_kernel, fold_theta=fold_theta,
                               mxu_dtype=mxu_dtype)

    # key/value block indices only change with the batch axis -> single-buffer them.
    resident = dict(pipeline_mode=pl.Buffered(1))

    # TODO(synk): for C < 8 the x/out tiles fill only C of 8 sublanes; packing two batches
    # per block would fill them (irrelevant for production C >= 8).
    in_specs = [
        pl.BlockSpec((None, C, tn), lambda b, n: (b, 0, n)),                     # x tile
        pl.BlockSpec((None, key_rows, M), lambda b, n: (b, 0, 0), **resident),   # key
        pl.BlockSpec((None, IC, M), lambda b, n: (b, 0, 0), **resident),         # value g
    ]
    operands = [x_cn, key, g_ck]
    if not fold_theta:
        in_specs.append(pl.BlockSpec((IC, C), lambda b, n: (0, 0)))              # w_theta
        operands.append(w_theta)
    in_specs += [
        pl.BlockSpec((C, IC), lambda b, n: (0, 0)),                              # w_W
        pl.BlockSpec((C, 1), lambda b, n: (0, 0)),                               # bn scale
        pl.BlockSpec((C, 1), lambda b, n: (0, 0)),                               # bn shift
    ]
    operands += [w_W, scale2, shift2]

    # Advisory cost estimate so XLA can overlap the phi/g projection with the kernel.
    qk_flops = 2 * B * N * M * C if fold_theta else 2 * B * N * (IC * C + M * IC)
    flops = qk_flops + 2 * B * N * M * IC + 2 * B * N * IC * C
    bytes_accessed = (2 * B * C * N * 4
                      + B * (key_rows + IC) * M * mxu_bytes
                      + 4 * (IC * C + C * IC + 2 * C))
    cost = pl.CostEstimate(flops=int(flops), transcendentals=int(B * N * (M + 1)),
                           bytes_accessed=int(bytes_accessed))

    out_cn = pl.pallas_call(
        kernel,
        out_shape=jax.ShapeDtypeStruct((B, C, N), x.dtype),
        grid_spec=pltpu.PrefetchScalarGridSpec(
            num_scalar_prefetch=0,
            grid=(B, N // tn),
            in_specs=in_specs,
            out_specs=pl.BlockSpec((None, C, tn), lambda b, n: (b, 0, n)),
        ),
        compiler_params=pltpu.CompilerParams(
            dimension_semantics=("parallel", "parallel"),
            vmem_limit_bytes=int(vmem_budget)),
        cost_estimate=cost,
    )(*operands)

    return out_cn.reshape(B, C, H, W)


def nonlocal_reference(x, y, w_theta, w_phi, w_g, w_W, bn_scale, bn_shift):
    """Pure-JAX mirror of the PyTorch forward (eval-mode BN), for correctness check."""
    B, C, H, W = x.shape
    IC = w_theta.shape[0]

    theta_x = jnp.einsum('bchw,kc->bkhw', x, w_theta).reshape(B, IC, -1)
    theta_x = jnp.transpose(theta_x, (0, 2, 1))                       # (B, N, IC)

    def pp(yv, w):
        p = jnp.einsum('bchw,kc->bkhw', yv, w)
        return p.reshape(B, IC, H // 2, 2, W // 2, 2).max(axis=(3, 5)).reshape(B, IC, -1)

    phi_y = pp(y, w_phi)                                              # (B, IC, M)
    g_y = jnp.transpose(pp(y, w_g), (0, 2, 1))                        # (B, M, IC)

    f = jnp.einsum('bnk,bkm->bnm', theta_x, phi_y)
    f_div_C = jax.nn.softmax(f, axis=-1)
    fxy = jnp.einsum('bnm,bmk->bnk', f_div_C, g_y)
    fxy = jnp.transpose(fxy, (0, 2, 1)).reshape(B, IC, H, W)
    W_xy = jnp.einsum('bkhw,ck->bchw', fxy, w_W)
    W_xy = W_xy * bn_scale.reshape(1, C, 1, 1) + bn_shift.reshape(1, C, 1, 1)
    return W_xy + x


if __name__ == "__main__":
    key = jax.random.PRNGKey(0)
    B, C, H, W = 2, 4, 16, 16
    IC = C // 2  # inter_channels

    ks = jax.random.split(key, 8)
    x = jax.random.normal(ks[0], (B, C, H, W), jnp.float32)
    y = jax.random.normal(ks[1], (B, C, H, W), jnp.float32)

    # 1x1-conv weights (Conv2d weight shape (out, in, 1, 1) squeezed to (out, in))
    w_theta = jax.random.normal(ks[2], (IC, C), jnp.float32) * 0.5
    w_phi   = jax.random.normal(ks[3], (IC, C), jnp.float32) * 0.5
    w_g     = jax.random.normal(ks[4], (IC, C), jnp.float32) * 0.5
    w_W     = jax.random.normal(ks[5], (C, IC), jnp.float32) * 0.5

    # Folded eval-mode BatchNorm (running_mean=0, running_var=1)
    eps = 1e-5
    gamma = jax.random.normal(ks[6], (C,), jnp.float32) * 0.1 + 1.0
    beta  = jax.random.normal(ks[7], (C,), jnp.float32) * 0.1
    bn_scale = gamma / jnp.sqrt(1.0 + eps)
    bn_shift = beta

    z_ref = nonlocal_reference(x, y, w_theta, w_phi, w_g, w_W, bn_scale, bn_shift)

    # Exact-semantics check: f32 MXU inputs + exact reciprocal -> tight tolerance.
    z32 = nonlocal_block(x, y, w_theta, w_phi, w_g, w_W, bn_scale, bn_shift,
                         mxu_dtype=jnp.float32)
    z32 = jax.block_until_ready(z32)
    assert z32.shape == (B, C, H, W)
    assert jnp.allclose(z32, z_ref, atol=1e-4, rtol=1e-4), "f32 kernel mismatch vs reference"

    # Fast path as used on v5e/v6e/v7x: bf16 MXU inputs + approx EUP reciprocal.
    # Expected accuracy of the fast path is ~bf16 logit precision (rel ~2^-8) feeding the
    # exp, so only the loose tolerance applies; semantics are validated by the f32 run.
    zbf = nonlocal_block(x, y, w_theta, w_phi, w_g, w_W, bn_scale, bn_shift,
                         mxu_dtype=jnp.bfloat16)
    zbf = jax.block_until_ready(zbf)
    assert zbf.shape == (B, C, H, W)
    assert jnp.allclose(zbf, z_ref, atol=1e-1, rtol=1e-1), "bf16 kernel mismatch vs reference"

    print("KERNEL_OK")
</pallas_src>

<mosaic_0001>
module attributes {stable_mosaic.version = 11 : i64} {
  func.func @_nonlocal_kernel(%arg0: i32, %arg1: i32, %arg2: memref<1x4x256xf32, #tpu.memory_space<vmem>>, %arg3: memref<1x4x64xf32, #tpu.memory_space<vmem>>, %arg4: memref<1x2x64xf32, #tpu.memory_space<vmem>>, %arg5: memref<4x2xf32, #tpu.memory_space<vmem>>, %arg6: memref<4x1xf32, #tpu.memory_space<vmem>>, %arg7: memref<4x1xf32, #tpu.memory_space<vmem>>, %arg8: memref<1x4x256xf32, #tpu.memory_space<vmem>>) attributes {dimension_semantics = [#tpu.dimension_semantics<parallel>, #tpu.dimension_semantics<parallel>], iteration_bounds = array<i64: 2, 1>, scalar_prefetch = 0 : i64, scratch_operands = 0 : i64, tpu.core_type = #tpu.core_type<tc>, window_params = [{transform_indices = @transform_0, window_bounds = array<i64: 1, 4, 256>}, {pipeline_mode = #tpu.pipeline_mode<synchronous>, transform_indices = @transform_1, window_bounds = array<i64: 1, 4, 64>}, {pipeline_mode = #tpu.pipeline_mode<synchronous>, transform_indices = @transform_2, window_bounds = array<i64: 1, 2, 64>}, {pipeline_mode = #tpu.pipeline_mode<synchronous>, transform_indices = @transform_3, window_bounds = array<i64: 4, 2>}, {pipeline_mode = #tpu.pipeline_mode<synchronous>, transform_indices = @transform_4, window_bounds = array<i64: 4, 1>}, {pipeline_mode = #tpu.pipeline_mode<synchronous>, transform_indices = @transform_5, window_bounds = array<i64: 4, 1>}, {transform_indices = @transform_6, window_bounds = array<i64: 1, 4, 256>}]} {
    %c0 = arith.constant 0 : index
    %c0_0 = arith.constant 0 : index
    %c0_1 = arith.constant 0 : index
    %0 = vector.load %arg2[%c0, %c0_0, %c0_1] : memref<1x4x256xf32, #tpu.memory_space<vmem>>, vector<1x4x256xf32>
    %1 = vector.shape_cast %0 : vector<1x4x256xf32> to vector<4x256xf32>
    %c0_2 = arith.constant 0 : index
    %c0_3 = arith.constant 0 : index
    %c0_4 = arith.constant 0 : index
    %2 = vector.load %arg3[%c0_2, %c0_3, %c0_4] : memref<1x4x64xf32, #tpu.memory_space<vmem>>, vector<1x4x64xf32>
    %3 = vector.shape_cast %2 : vector<1x4x64xf32> to vector<4x64xf32>
    %cst = arith.constant dense<0.000000e+00> : vector<64x256xf32>
    %4 = tpu.matmul %3, %1, %cst {dimension_numbers = #tpu.dot_dimension_numbers<[0], [0], [1], [1], [0, 1, 1, 1], [], []>} : vector<4x64xf32>, vector<4x256xf32>, vector<64x256xf32> -> vector<64x256xf32>
    %cst_5 = arith.constant dense<0xFF800000> : vector<256xf32>
    %5 = vector.multi_reduction <maximumf>, %4, %cst_5 [0] : vector<64x256xf32> to vector<256xf32>
    %6 = vector.shape_cast %5 : vector<256xf32> to vector<1x256xf32>
    %7 = vector.broadcast %6 : vector<1x256xf32> to vector<64x256xf32>
    %8 = arith.subf %4, %7 : vector<64x256xf32>
    %9 = math.exp %8 : vector<64x256xf32>
    %cst_6 = arith.constant dense<0.000000e+00> : vector<256xf32>
    %10 = vector.multi_reduction <add>, %9, %cst_6 [0] : vector<64x256xf32> to vector<256xf32>
    %11 = vector.shape_cast %10 : vector<256xf32> to vector<1x256xf32>
    %c0_7 = arith.constant 0 : index
    %c0_8 = arith.constant 0 : index
    %c0_9 = arith.constant 0 : index
    %12 = vector.load %arg4[%c0_7, %c0_8, %c0_9] : memref<1x2x64xf32, #tpu.memory_space<vmem>>, vector<1x2x64xf32>
    %13 = vector.shape_cast %12 : vector<1x2x64xf32> to vector<2x64xf32>
    %cst_10 = arith.constant dense<0.000000e+00> : vector<2x256xf32>
    %14 = tpu.matmul %13, %9, %cst_10 {dimension_numbers = #tpu.dot_dimension_numbers<[1], [0], [0], [1], [0, 0, 1, 1], [], []>} : vector<2x64xf32>, vector<64x256xf32>, vector<2x256xf32> -> vector<2x256xf32>
    %15 = tpu.reciprocal %11 : vector<1x256xf32> -> vector<1x256xf32>
    %16 = vector.broadcast %15 : vector<1x256xf32> to vector<2x256xf32>
    %17 = arith.mulf %14, %16 : vector<2x256xf32>
    %c0_11 = arith.constant 0 : index
    %c0_12 = arith.constant 0 : index
    %18 = vector.load %arg5[%c0_11, %c0_12] : memref<4x2xf32, #tpu.memory_space<vmem>>, vector<4x2xf32>
    %cst_13 = arith.constant dense<0.000000e+00> : vector<4x256xf32>
    %19 = tpu.matmul %18, %17, %cst_13 {dimension_numbers = #tpu.dot_dimension_numbers<[1], [0], [0], [1], [0, 0, 1, 1], [], []>} : vector<4x2xf32>, vector<2x256xf32>, vector<4x256xf32> -> vector<4x256xf32>
    %c0_14 = arith.constant 0 : index
    %c0_15 = arith.constant 0 : index
    %20 = vector.load %arg6[%c0_14, %c0_15] : memref<4x1xf32, #tpu.memory_space<vmem>>, vector<4x1xf32>
    %21 = vector.broadcast %20 : vector<4x1xf32> to vector<4x256xf32>
    %22 = arith.mulf %19, %21 : vector<4x256xf32>
    %c0_16 = arith.constant 0 : index
    %c0_17 = arith.constant 0 : index
    %23 = vector.load %arg7[%c0_16, %c0_17] : memref<4x1xf32, #tpu.memory_space<vmem>>, vector<4x1xf32>
    %24 = vector.broadcast %23 : vector<4x1xf32> to vector<4x256xf32>
    %25 = arith.addf %22, %24 : vector<4x256xf32>
    %26 = arith.addf %25, %1 : vector<4x256xf32>
    %c0_18 = arith.constant 0 : index
    %c0_19 = arith.constant 0 : index
    %c0_20 = arith.constant 0 : index
    %27 = vector.load %arg8[%c0_18, %c0_19, %c0_20] : memref<1x4x256xf32, #tpu.memory_space<vmem>>, vector<1x4x256xf32>
    %28 = vector.shape_cast %27 : vector<1x4x256xf32> to vector<4x256xf32>
    %29 = vector.shape_cast %26 : vector<4x256xf32> to vector<1x4x256xf32>
    tpu.vector_store %arg8[%c0_18, %c0_19, %c0_20], %29 {strides = array<i32>} : memref<1x4x256xf32, #tpu.memory_space<vmem>>, vector<1x4x256xf32>,
    return
  }
  func.func @transform_0(%arg0: i32, %arg1: i32) -> (i32, i32, i32) {
    %c0_i32 = arith.constant 0 : i32
    %c0_i32_0 = arith.constant 0 : i32
    return %arg0, %c0_i32, %arg1 : i32, i32, i32
  }
  func.func @transform_1(%arg0: i32, %arg1: i32) -> (i32, i32, i32) {
    %c0_i32 = arith.constant 0 : i32
    %c0_i32_0 = arith.constant 0 : i32
    %c0_i32_1 = arith.constant 0 : i32
    return %arg0, %c0_i32, %c0_i32_0 : i32, i32, i32
  }
  func.func @transform_2(%arg0: i32, %arg1: i32) -> (i32, i32, i32) {
    %c0_i32 = arith.constant 0 : i32
    %c0_i32_0 = arith.constant 0 : i32
    %c0_i32_1 = arith.constant 0 : i32
    return %arg0, %c0_i32, %c0_i32_0 : i32, i32, i32
  }
  func.func @transform_3(%arg0: i32, %arg1: i32) -> (i32, i32) {
    %c0_i32 = arith.constant 0 : i32
    %c0_i32_0 = arith.constant 0 : i32
    %c0_i32_1 = arith.constant 0 : i32
    return %c0_i32, %c0_i32_0 : i32, i32
  }
  func.func @transform_4(%arg0: i32, %arg1: i32) -> (i32, i32) {
    %c0_i32 = arith.constant 0 : i32
    %c0_i32_0 = arith.constant 0 : i32
    %c0_i32_1 = arith.constant 0 : i32
    return %c0_i32, %c0_i32_0 : i32, i32
  }
  func.func @transform_5(%arg0: i32, %arg1: i32) -> (i32, i32) {
    %c0_i32 = arith.constant 0 : i32
    %c0_i32_0 = arith.constant 0 : i32
    %c0_i32_1 = arith.constant 0 : i32
    return %c0_i32, %c0_i32_0 : i32, i32
  }
  func.func @transform_6(%arg0: i32, %arg1: i32) -> (i32, i32, i32) {
    %c0_i32 = arith.constant 0 : i32
    %c0_i32_0 = arith.constant 0 : i32
    return %arg0, %c0_i32, %arg1 : i32, i32, i32
  }
}

</mosaic_0001>

<bundles_post_ra>
// kernel: tpu_custom_call.1
= control target key start
LH: loop header
LB: loop body
LE: loop exit
PB: predicated region body
PF: predicated region fallthrough
CT: control target
= control target key end

     0   :  { %11 = vsyncpa [#allocation3], 0  ;;  %s1411_s0 = inlined_call_operand.hbm [shape: f32[2,4,256], index: 0, kind: input, shape index: {}]   ;;  %s1412_s1 = inlined_call_operand.vmem [shape: f32[2,4,64], index: 1, kind: input, shape index: {}]   ;;  %s1413_s2 = inlined_call_operand.vmem [shape: f32[2,2,64], index: 2, kind: input, shape index: {}]   ;;  %s1414_s3 = inlined_call_operand.vmem [shape: f32[4,2], index: 3, kind: input, shape index: {}]   ;;  %s1415_s4 = inlined_call_operand.vmem [shape: f32[4,1], index: 4, kind: input, shape index: {}]   ;;  %s1416_s5 = inlined_call_operand.vmem [shape: f32[4,1], index: 5, kind: input, shape index: {}]   ;;  %s1417_s6 = inlined_call_operand.hbm [shape: f32[2,4,256], index: 6, kind: output, shape index: {}]  }
   0x1   :  { %13 = vsyncpa [#allocation3 + $0x1], 0 }
   0x2   :  { %14 = vsyncpa [#allocation4], 0 }
   0x3   :  { %16 = vsyncpa [#allocation4 + $0x1], 0  ;;  %s1204_s21 = smov 0   ;;  %s1206_s22 = smov 0  }
   0x4   :  { %s1208_s23 = smov 0   ;;  %s1210_s24 = smov 0  }
   0x5   :  { %s1212_s25 = smov 0   ;;  %s1214_s26 = smov 0  }
   0x6 LB: > { %s919_s27 = sadd.s32 4294967295, %s1163_s26   ;;  %s920_s28 = sadd.s32 4294967294, %s1163_s26   ;;  %s1163_s26 = sphi %s1214_s26, %s22_s26   ;;  %s1159_s25 = sphi %s1212_s25, %s1429_s25   ;;  %s1155_s24 = sphi %s1210_s24, %s1428_s24   ;;  %s1151_s23 = sphi %s1208_s23, %s1427_s23   ;;  %s1147_s22 = sphi %s1206_s22, %s1426_s22   ;;  %s1143_s21 = sphi %s1204_s21, %s1425_s21  }
   0x7   : > { %s34_s29 = sadd.s32 1, %s1159_s25  ;;  %s43_s30 = sadd.s32 1, %s1151_s23 }
   0x8   : > { %p36_p0 = scmp.ge.s32.totalorder %s34_s29, 2  ;;  %p50_p1 = scmp.ne.s32.totalorder %s1151_s23, %s1147_s22 }
   0x9   : > { %p51_p2 = scmp.eq.s32.totalorder %s1163_s26, 0  ;;  %p56_p3 = scmp.ne.s32.totalorder %s1147_s22, %s1143_s21 }
   0xa   : > { %s1431_s29 = smov (%p36_p0, %s34_s29), 0  ;;  %p57_p5 = scmp.eq.s32.totalorder %s919_s27, 0 }
   0xb   : > { %p1245_p4 = por %p51_p2, %p50_p1  ;;  %s38_s8 = ssub.s32 %s1159_s25, %s1431_s29 }
   0xc   : > { %p197_p6 = scmp.eq.s32.totalorder %s919_s27, 1  ;;  %p41_p7 = scmp.eq.s32.totalorder %s38_s8, 0 }
   0xd   : > { %p1251_p8 = por %p57_p5, %p56_p3  ;;  %p203_p10 = scmp.eq.s32.totalorder %s920_s28, 1 }
   0xe   : > { %p1255_p9 = por %p197_p6, %p50_p1  ;;  %p964_p13 = scmp.lt.s32.totalorder %s1163_s26, 2 }
   0xf   : > { %s1260_s11 = scalar_select %p41_p7, %s1151_s23, %s43_s30  }
  0x10   : > { %p1262_p11 = por %p203_p10, %p56_p3  ;;  %s246_s13 = sand.u32 1, %s1151_s23  }
  0x11   : > { %s923_s14 = sshll.u32 %s246_s13, 3  ;;  %s950_s15 = sshll.u32 %s1159_s25, 7 }
  0x12   : > { %s1421_s12 = scalar_select %p1262_p11, 1, 0 }
  0x13   : > { %s258_s18 = scalar_lea.hbm %s1411_s0, %s950_s15  ;;  %s250_s19 = scalar_lea.vmem [#allocation2], %s923_s14 }
  0x14   : > { %s260_s20 = sshll.u32 %s250_s19, 4  ;;  %p1275_p0 = pnand %p964_p13, %p1245_p4  ;;  %s261_s20 = int_to_ptr.vmem [resolvable:$true] %s260_s20 }
  0x15   : > { %p926_p1 = scmp.ge.s32.totalorder %s1163_s26, 1  ;;  %p265_p2 = scmp.lt.s32.totalorder %s1163_s26, 3 }
  0x16   : > { %s247_s28 = scalar_lea.sflag [#allocation3], %s246_s13  ;;  %p1057_p3 = pneg %p1275_p0 }
  0x17   : > { %s1068_s30 = scalar_lea.vmem %s261_s20, 128  ;;  %s1165_s8 = smov [#allocation2]  }
  0x18   : > { %p1069_p5 = scmp.ne.s32.totalorder %s261_s20, %s1068_s30  ;;  %s1073_s15 = sshll.u32 %s1165_s8, 4  ;;  %s1074_s15 = int_to_ptr.vmem [resolvable:$false] %s1073_s15 }
  0x19   : > { %s1075_s14 = scalar_lea.vmem %s1074_s15, 256  ;;  %p1076_p10 = scmp.lt.s32.totalorder %s261_s20, %s1074_s15 }
  0x1a   : > { %p1071_p6 = pnand %p1069_p5, %p1057_p3  ;;  %p1077_p12 = scmp.lt.s32.totalorder %s1075_s14, %s1068_s30 }
  0x1c   : > { %p1072_p7 = pneg %p1071_p6  ;;  %p1078_p4 = por %p1077_p12, %p1076_p10 }
  0x1e   : > { %p1079_p13 = pnand %p1078_p4, %p1072_p7 }
  0x20   : > { %1082 = shalt.err (!%p1079_p13)
}
  0x21   : > { %959 = dma.hbm_to_vmem [thread:$0]  (!%p1275_p0), %s258_s18, 128, %s261_s20, %s247_s28  }
  0x22   : > { %p266_p11 = pnand %p926_p1, %p265_p2 }
  0x23   : > { %s1290_s7 = sand.u32 (!%p266_p11), 1, %s1147_s22  }
  0x24   : > { %269 = sbr.rel (%p266_p11) target bundleno = 873 (0x369), region = 44  ;;  %s927_s13 = sshll.u32 (!%p266_p11), %s1290_s7, 3 }
  0x25   : > { %s272_s16 = scalar_lea.sflag (!%p266_p11), [#allocation3], %s1290_s7  ;;  %s275_s17 = scalar_lea.vmem (!%p266_p11), [#allocation2], %s927_s13 }
  0x29   : > { %1134 = dma.done.wait (%p1251_p8), %s272_s16, 128  }
  0x2a   : > { %1136 = vsyncadd (%p1251_p8), %s272_s16, 4294967168  ;;  %p313_p12 = scmp.lt.s32.totalorder %s1155_s24, 1  ;;  %v1166_v0 = vmov 0.0   ;;  %v1310_v2 = vld [vmem:[%s275_s17] sm:$0xff]  ;;  %vm383_vm0 = vcmask 1043456   ;;  %vm358_vm1 = vcmask 31744  }
  0x2b   : > { %452 = vmatprep.mubr.f32.mxu0 %v1166_v0  ;;  %670 = vmatprep.mubr.f32.mxu1 %v1166_v0  ;;  %v1314_v3 = vcombine.high %v1310_v2, %v1310_v2  ;;  %vm602_vm2 = vcmask 523264   ;;  %vm686_vm3 = vcmask 1041408   ;;  %vm682_vm4 = vcmask 15360   ;;  %s951_s27 = sshll.u32 %s1155_s24, 7  ;;  %s789_s14 = scalar_lea.sflag [#allocation4], %s1290_s7 }
  0x2c   : > { %s1304_s18 = scalar_select %p313_p12, %s1155_s24, 1 }
  0x2d   : > { %931 = vmatprep.subr.msk.mxu0 %vm383_vm0, %v1314_v3  ;;  %s1168_s24 = smov [#allocation5]  }
  0x2e   : > { %s929_s19 = sshll.u32 %s1304_s18, 2  ;;  %932 = vmatpush1.msk.msra.mxu0 %vm383_vm0, %v1310_v2  ;;  %s930_s9 = sshll.u32 %s1304_s18, 1 }
  0x2f   : > { %s316_s28 = scalar_lea.vmem %s1412_s1, %s929_s19  ;;  %s320_s15 = scalar_lea.vmem %s1413_s2, %s930_s9 }
  0x30   : > { %v323_v1 = vld [vmem:[%s316_s28] sm:$0xf]  ;;  %s311_s28 = scalar_lea.vmem [#allocation5], %s927_s13  ;;  %s1087_s13 = sshll.u32 %s1168_s24, 4  ;;  %s1088_s13 = int_to_ptr.vmem [resolvable:$false] %s1087_s13 }
  0x31   : > { %324 = vxpose.xlu0.b32.start.end [1/1] (short) (narrow) %v323_v1, 64  ;;  %s805_s9 = sshll.u32 %s311_s28, 4  ;;  %s1089_s17 = scalar_lea.vmem %s1088_s13, 256  ;;  %s806_s9 = int_to_ptr.vmem [resolvable:$true] %s805_s9 }
  0x32   : > { %s1083_s16 = scalar_lea.vmem %s806_s9, 128  ;;  %p1090_p1 = scmp.lt.s32.totalorder %s806_s9, %s1088_s13 }
  0x33   : > { %p1084_p8 = scmp.ne.s32.totalorder %s806_s9, %s1083_s16  ;;  %p1091_p2 = scmp.lt.s32.totalorder %s1089_s17, %s1083_s16 }
  0x35   : > { %p1085_p11 = pnand %p1084_p8, %p1255_p9  ;;  %p1092_p3 = por %p1091_p2, %p1090_p1 }
  0x37   : > { %p1086_p0 = pneg %p1085_p11 }
  0x39   : > { %p1093_p5 = pnand %p1092_p3, %p1086_p0 }
  0xad   : > { %v340_v4 = vpop.trf.xlu0 }
  0xae   : > { %933 = vmatmul.mubr.msk.f32.vlgmr.msra.gmra.mxu0 %vm358_vm1, %v340_v4 }
  0xaf   : > { %458 = vmatprep.mubr.f32.mxu0 %v1166_v0 }
  0xb1   : > { %v341_v5 = vpop.trf.xlu0 }
  0xb2   : > { %934 = vmatmul.mubr.msk.f32.gmra.mxu0 %vm358_vm1, %v341_v5 }
  0xb3   : > { %464 = vmatprep.mubr.f32.mxu0 %v1166_v0 }
  0xb5   : > { %v342_v6 = vpop.trf.xlu0 }
  0xb6   : > { %935 = vmatmul.mubr.msk.f32.gmra.mxu0 %vm358_vm1, %v342_v6 }
  0xb7   : > { %470 = vmatprep.mubr.f32.mxu0 %v1166_v0 }
  0xb9   : > { %v343_v7 = vpop.trf.xlu0 }
  0xba   : > { %936 = vmatmul.mubr.msk.f32.gmra.mxu0 %vm358_vm1, %v343_v7 }
  0xbb   : > { %476 = vmatprep.mubr.f32.mxu0 %v1166_v0 }
  0xbd   : > { %v344_v8 = vpop.trf.xlu0 }
  0xbe   : > { %937 = vmatmul.mubr.msk.f32.gmra.mxu0 %vm358_vm1, %v344_v8 }
  0xbf   : > { %482 = vmatprep.mubr.f32.mxu0 %v1166_v0 }
  0xc1   : > { %v345_v9 = vpop.trf.xlu0 }
  0xc2   : > { %938 = vmatmul.mubr.msk.f32.gmra.mxu0 %vm358_vm1, %v345_v9 }
  0xc3   : > { %488 = vmatprep.mubr.f32.mxu0 %v1166_v0 }
  0xc5   : > { %v346_v10 = vpop.trf.xlu0 }
  0xc6   : > { %939 = vmatmul.mubr.msk.f32.gmra.mxu0 %vm358_vm1, %v346_v10 }
  0xc7   : > { %494 = vmatprep.mubr.f32.mxu0 %v1166_v0 }
  0xc9   : > { %v347_v11 = vpop.trf.xlu0 }
  0xca   : > { %940 = vmatmul.mubr.msk.f32.gmra.mxu0 %vm358_vm1, %v347_v11 }
 0x16e   : > { %v454_v12 = vpop.f32.mrf.mxu0 }
 0x170   : > { %v456_v13 = vpop.f32.mrf.mxu0 }
 0x172   : > { %v460_v14 = vpop.f32.mrf.mxu0 }
 0x174   : > { %v462_v15 = vpop.f32.mrf.mxu0 }
 0x176   : > { %v466_v16 = vpop.f32.mrf.mxu0 }
 0x177   : > { %v501_v25 = vmax.f32 %v454_v12, %v466_v16 }
 0x178   : > { %v1333_v17 = vpop.f32.mrf.mxu0 }
 0x179   : > { %v514_v28 = vmax.f32 %v456_v13, %v1333_v17 }
 0x17a   : > { %v472_v18 = vpop.f32.mrf.mxu0 }
 0x17b   : > { %v502_v26 = vmax.f32 %v460_v14, %v472_v18 }
 0x17c   : > { %v1335_v19 = vpop.f32.mrf.mxu0 }
 0x17d   : > { %v515_v29 = vmax.f32 %v462_v15, %v1335_v19 }
 0x17e   : > { %v478_v20 = vpop.f32.mrf.mxu0 }
 0x17f   : > { %v503_v30 = vmax.f32 %v501_v25, %v478_v20 }
 0x180   : > { %v1337_v21 = vpop.f32.mrf.mxu0 }
 0x181   : > { %v516_v33 = vmax.f32 %v514_v28, %v1337_v21 }
 0x182   : > { %v484_v22 = vpop.f32.mrf.mxu0 }
 0x183   : > { %v504_v31 = vmax.f32 %v502_v26, %v484_v22 }
 0x184   : > { %v1339_v23 = vpop.f32.mrf.mxu0 }
 0x185   : > { %v517_v34 = vmax.f32 %v515_v29, %v1339_v23 }
 0x186   : > { %v490_v24 = vpop.f32.mrf.mxu0 }
 0x187   : > { %v505_v35 = vmax.f32 %v503_v30, %v490_v24 }
 0x188   : > { %v1341_v27 = vpop.f32.mrf.mxu0 }
 0x189   : > { %v518_v38 = vmax.f32 %v516_v33, %v1341_v27 }
 0x18a   : > { %v496_v32 = vpop.f32.mrf.mxu0 }
 0x18b   : > { %v506_v36 = vmax.f32 %v504_v31, %v496_v32 }
 0x18c   : > { %v498_v37 = vpop.f32.mrf.mxu0 }
 0x18d   : > { %v507_v39 = vmax.f32 %v505_v35, %v506_v36  ;;  %v519_v40 = vmax.f32 %v517_v34, %v498_v37 }
 0x18f   : > { %v508_v41 = vrot.slane %v507_v39, 4  ;;  %v520_v42 = vmax.f32 %v518_v38, %v519_v40 }
 0x191   : > { %v509_v43 = vmax.f32 %v507_v39, %v508_v41  ;;  %v521_v44 = vrot.slane %v520_v42, 4 }
 0x193   : > { %v510_v45 = vrot.slane %v509_v43, 2  ;;  %v522_v46 = vmax.f32 %v520_v42, %v521_v44 }
 0x195   : > { %v511_v47 = vmax.f32 %v509_v43, %v510_v45  ;;  %v523_v48 = vrot.slane %v522_v46, 2 }
 0x197   : > { %v512_v49 = vrot.slane %v511_v47, 1  ;;  %v524_v50 = vmax.f32 %v522_v46, %v523_v48 }
 0x199   : > { %v513_v51 = vmax.f32 %v511_v47, %v512_v49  ;;  %v525_v52 = vrot.slane %v524_v50, 1 }
 0x19b   : > { %v527_v53 = vsub.f32 %v454_v12, %v513_v51  ;;  %v529_v54 = vsub.f32 %v460_v14, %v513_v51  ;;  %v531_v55 = vsub.f32 %v466_v16, %v513_v51  ;;  %v533_v56 = vsub.f32 %v472_v18, %v513_v51 }
 0x19c   : > { %v535_v57 = vsub.f32 %v478_v20, %v513_v51  ;;  %v526_v60 = vmax.f32 %v524_v50, %v525_v52  ;;  %v537_v61 = vsub.f32 %v484_v22, %v513_v51  ;;  %v539_v5 = vsub.f32 %v490_v24, %v513_v51 }
 0x19d   : > { %v543_v58 = vmul.f32 1.442695, %v527_v53  ;;  %v547_v59 = vmul.f32 1.442695, %v529_v54  ;;  %v551_v62 = vmul.f32 1.442695, %v531_v55  ;;  %v541_v9 = vsub.f32 %v496_v32, %v513_v51 }
 0x19e   : > { %v528_v63 = vsub.f32 %v456_v13, %v526_v60  ;;  %v555_v1 = vmul.f32 1.442695, %v533_v56  ;;  %v530_v4 = vsub.f32 %v462_v15, %v526_v60  ;;  %v559_v6 = vmul.f32 1.442695, %v535_v57  ;;  %v601_v55 = vld [vmem:[%s320_s15] sm:$0x3]  ;;  %s803_s15 = scalar_lea.hbm %s1417_s6, %s951_s27 }
 0x19f   : > { %1019 = vpow2.f32 %v543_v58  ;;  %v563_v7 = vmul.f32 1.442695, %v537_v61  ;;  %v532_v8 = vsub.f32 %v1333_v17, %v526_v60  ;;  %v534_v11 = vsub.f32 %v1335_v19, %v526_v60  ;;  %v764_v56 = vld [vmem:[%s1415_s4] sm:$0xf] }
 0x1a0   : > { %1021 = vpow2.f32 %v547_v59  ;;  %v545_v10 = vmul.f32 1.442695, %v528_v63  ;;  %v549_v12 = vmul.f32 1.442695, %v530_v4  ;;  %v567_v14 = vmul.f32 1.442695, %v539_v5 }
 0x1a1   : > { %1023 = vpow2.f32 %v551_v62  ;;  %v536_v16 = vsub.f32 %v1337_v21, %v526_v60  ;;  %v542_v13 = vsub.f32 %v498_v37, %v526_v60  ;;  %v553_v18 = vmul.f32 1.442695, %v532_v8  ;;  %v772_v57 = vld [vmem:[%s1416_s5] sm:$0xf] }
 0x1a2   : > { %1025 = vpow2.f32 %v555_v1  ;;  %v571_v15 = vmul.f32 1.442695, %v541_v9  ;;  %v538_v20 = vsub.f32 %v1339_v23, %v526_v60  ;;  %v540_v22 = vsub.f32 %v1341_v27, %v526_v60 }
 0x1a3   : > { %1027 = vpow2.f32 %v559_v6  ;;  %v557_v17 = vmul.f32 1.442695, %v534_v11  ;;  %v561_v24 = vmul.f32 1.442695, %v536_v16  ;;  %v573_v19 = vmul.f32 1.442695, %v542_v13 }
 0x1a4   : > { %1029 = vpow2.f32 %v563_v7  ;;  %v565_v25 = vmul.f32 1.442695, %v538_v20  ;;  %v569_v21 = vmul.f32 1.442695, %v540_v22  ;;  %v1167_v58 = vmov 0  }
 0x1a5   : > { %1031 = vpow2.f32 %v545_v10  ;;  %1016 = vset.pattern.permute.xlu0 %v1167_v58  ;;  %1017 = vset.pattern.permute.xlu1 %v1167_v58  ;;  %v681_v13 = vld [vmem:[%s1414_s3] sm:$0xf] }
 0x1a6   : > { %1033 = vpow2.f32 %v549_v12  ;;  %767 = vperm.xlu0 %1016, %v764_v56   ;;  %775 = vperm.xlu1 %1017, %v772_v57  }
 0x1a7   : > { %1035 = vpow2.f32 %v567_v14 }
 0x1a8   : > { %1037 = vpow2.f32 %v553_v18 }
 0x1a9   : > { %1039 = vpow2.f32 %v571_v15 }
 0x1aa   : > { %1041 = vpow2.f32 %v557_v17 }
 0x1ab   : > { %1043 = vpow2.f32 %v561_v24 }
 0x1ac   : > { %v1020_v26 = vpop.eup %1019  ;;  %1045 = vpow2.f32 %v573_v19 }
 0x1ad   : > { %v1022_v28 = vpop.eup %1021  ;;  %1047 = vpow2.f32 %v565_v25 }
 0x1ae   : > { %v575_v29 = vadd.f32 %v1022_v28, %v1020_v26  ;;  %v1024_v30 = vpop.eup %1023  ;;  %1049 = vpow2.f32 %v569_v21 }
 0x1af   : > { %v1026_v27 = vpop.eup %1025 }
 0x1b0   : > { %v576_v23 = vadd.f32 %v1024_v30, %v575_v29  ;;  %v1028_v31 = vpop.eup %1027 }
 0x1b1   : > { %v1030_v33 = vpop.eup %1029 }
 0x1b2   : > { %v577_v32 = vadd.f32 %v1026_v27, %v576_v23  ;;  %v1032_v34 = vpop.eup %1031 }
 0x1b3   : > { %v1034_v36 = vpop.eup %1033 }
 0x1b4   : > { %v578_v35 = vadd.f32 %v1028_v31, %v577_v32  ;;  %v1036_v37 = vpop.eup %1035  ;;  %v588_v39 = vadd.f32 %v1034_v36, %v1032_v34 }
 0x1b5   : > { %v1038_v40 = vpop.eup %1037 }
 0x1b6   : > { %v579_v38 = vadd.f32 %v1030_v33, %v578_v35  ;;  %v1040_v41 = vpop.eup %1039  ;;  %v589_v43 = vadd.f32 %v1038_v40, %v588_v39 }
 0x1b7   : > { %v1042_v44 = vpop.eup %1041 }
 0x1b8   : > { %v580_v42 = vadd.f32 %v1036_v37, %v579_v38  ;;  %v1044_v45 = vpop.eup %1043  ;;  %v590_v47 = vadd.f32 %v1042_v44, %v589_v43 }
 0x1b9   : > { %v1046_v48 = vpop.eup %1045 }
 0x1ba   : > { %v581_v46 = vadd.f32 %v1040_v41, %v580_v42  ;;  %v1048_v49 = vpop.eup %1047  ;;  %v591_v50 = vadd.f32 %v1044_v45, %v590_v47  ;;  %622 = vmatprep.subr.mxu1 %v1046_v48 }
 0x1bb   : > { %v1050_v51 = vpop.eup %1049  ;;  %623 = vmatpush1.msra.mxu1 %v1040_v41 }
 0x1bc   : > { %v592_v52 = vadd.f32 %v1048_v49, %v591_v50  ;;  %624 = vmatprep.subr.mxu1 %v1050_v51  ;;  %v582_v60 = vrot.slane %v581_v46, 4 }
 0x1bd   : > { %625 = vmatpush1.msra.mxu1 %v1036_v37 }
 0x1be   : > { %v593_v53 = vadd.f32 %v1050_v51, %v592_v52  ;;  %626 = vmatprep.subr.mxu1 %v1048_v49  ;;  %v583_v62 = vadd.f32 %v582_v60, %v581_v46 }
 0x1bf   : > { %627 = vmatpush1.msra.mxu1 %v1030_v33 }
 0x1c0   : > { %v594_v54 = vadd.f32 %v1046_v48, %v593_v53  ;;  %628 = vmatprep.subr.mxu1 %v1044_v45  ;;  %v584_v1 = vrot.slane %v583_v62, 2 }
 0x1c1   : > { %629 = vmatpush1.msra.mxu1 %v1028_v31 }
 0x1c2   : > { %630 = vmatprep.subr.mxu1 %v1042_v44  ;;  %v595_v59 = vrot.slane %v594_v54, 4  ;;  %v585_v4 = vadd.f32 %v584_v1, %v583_v62 }
 0x1c3   : > { %631 = vmatpush1.msra.mxu1 %v1026_v27 }
 0x1c4   : > { %632 = vmatprep.subr.mxu1 %v1038_v40  ;;  %v596_v61 = vadd.f32 %v595_v59, %v594_v54  ;;  %v586_v6 = vrot.slane %v585_v4, 1 }
 0x1c5   : > { %633 = vmatpush1.msra.mxu1 %v1024_v30 }
 0x1c6   : > { %634 = vmatprep.subr.mxu1 %v1034_v36  ;;  %v597_v63 = vrot.slane %v596_v61, 2  ;;  %v587_v8 = vadd.f32 %v586_v6, %v585_v4 }
 0x1c7   : > { %635 = vmatpush1.msra.mxu1 %v1022_v28 }
 0x1c8   : > { %636 = vmatprep.subr.mxu1 %v1032_v34 }
 0x1c9   : > { %637 = vmatpush1.msra.mxu1 %v1020_v26 }
 0x1ca   : > { %941 = vmatmul.mubr.msk.f32.vlgmr.msra.gmra.mxu1 %vm602_vm2, %v601_v55 }
 0x1cb   : > { %757 = vmatprep.mubr.f32.mxu1 %v1166_v0  ;;  %v598_v0 = vadd.f32 %v597_v63, %v596_v61 }
 0x1cd   : > { %v599_v5 = vrot.slane %v598_v0, 1 }
 0x1cf   : > { %v600_v7 = vadd.f32 %v599_v5, %v598_v0 }
 0x1d1   : > { %1051 = vrcp.f32 %v600_v7 }
 0x1d2   : > { %1053 = vrcp.f32 %v587_v8 }
 0x1de   : > { %v1052_v10 = vpop.eup %1051 }
 0x1df   : > { %v1054_v12 = vpop.eup %1053 }
 0x221   : > { %v768_v18 = vpop.permute.xlu0 %767  ;;  %v776_v20 = vpop.permute.xlu1 %775 }
 0x28a   : > { %v672_v9 = vpop.f32.mrf.mxu1 }
 0x28b   : > { %v679_v16 = vmul.f32 %v1054_v12, %v672_v9 }
 0x28c   : > { %v674_v11 = vpop.f32.mrf.mxu1 }
 0x28d   : > { %v680_v14 = vmul.f32 %v1052_v10, %v674_v11 }
 0x28f   : > { %942 = vmatprep.subr.msk.mxu1 %vm686_vm3, %v680_v14 }
 0x290   : > { %943 = vmatpush1.msk.msra.mxu1 %vm686_vm3, %v679_v16 }
 0x291   : > { %944 = vmatmul.mubr.msk.f32.vlgmr.msra.gmra.mxu1 %vm682_vm4, %v681_v13 }
 0x351   : > { %v759_v15 = vpop.f32.mrf.mxu1 }
 0x352   : > { %v770_v22 = vmul.f32 %v768_v18, %v759_v15 }
 0x353   : > { %v761_v17 = vpop.f32.mrf.mxu1 }
 0x354   : > { %v771_v24 = vmul.f32 %v768_v18, %v761_v17  ;;  %v778_v19 = vadd.f32 %v776_v20, %v770_v22 }
 0x356   : > { %v779_v25 = vadd.f32 %v776_v20, %v771_v24  ;;  %v781_v26 = vadd.f32 %v778_v19, %v1310_v2 }
 0x358   : > { %v782_v21 = vadd.f32 %v779_v25, %v1314_v3 }
 0x35a   : > { %v785_v28 = vcombine.low %v781_v26, %v782_v21 }
 0x35c   : > { %787 = vst [vmem:[%s311_s28] sm:$0xff] %v785_v28 }
 0x35d   : > { %1096 = shalt.err (!%p1093_p5)
}
 0x35e   : > { %s1097_s18 = scalar_lea.hbm %s803_s15, 128  ;;  %s1101_s20 = scalar_lea.hbm %s1417_s6, 256 }
 0x35f   : > { %p1098_p6 = scmp.ne.s32.totalorder %s803_s15, %s1097_s18  ;;  %p1102_p4 = scmp.lt.s32.totalorder %s803_s15, %s1417_s6 }
 0x360   : > { %p1103_p13 = scmp.lt.s32.totalorder %s1101_s20, %s1097_s18 }
 0x361   : > { %p1099_p7 = pnand %p1098_p6, %p1255_p9 }
 0x362   : > { %p1104_p12 = por %p1103_p13, %p1102_p4 }
 0x363   : > { %p1100_p10 = pneg %p1099_p7 }
 0x365   : > { %p1105_p8 = pnand %p1104_p12, %p1100_p10 }
 0x367   : > { %1108 = shalt.err (!%p1105_p8)
}
 0x368   : > { %954 = dma.vmem_to_hbm [thread:$0]  (%p1255_p9), %s806_s9, 128, %s803_s15, %s789_s14  }
 0x369 PF: > { %s817_s30 = sand.u32 1, %s1143_s21   ;;  %p1423_p11 = scmp.ne.s32.totalorder %s1421_s12, 0 }
 0x36a   : > { %p1424_p0 = scmp.ge.s32.totalorder %s1163_s26, 2  ;;  %s818_s8 = scalar_lea.sflag [#allocation4], %s817_s30 }
 0x36c   : > { %p961_p1 = pnand %p1424_p0, %p1423_p11 }
 0x36e   : > { %p962_p2 = pneg %p961_p1 }
 0x370   : > { %1138 = dma.done.wait (%p962_p2), %s818_s8, 128  }
 0x371   : > { %1140 = vsyncadd (%p962_p2), %s818_s8, 4294967168  ;;  %s22_s26 = sadd.s32 1, %s1163_s26   ;;  %s1425_s21 = smov %s1147_s22 }
 0x372   : > { %p19_p3 = scmp.ge.s32.totalorder %s22_s26, 4   ;;  %s1426_s22 = smov %s1151_s23 }
 0x373   : > { %s1427_s23 = smov %s1260_s11  ;;  %s1428_s24 = smov %s1159_s25 }
 0x374   : > { %s1429_s25 = smov %s1431_s29  ;;  %21 = sbr.rel (!%p19_p3) target bundleno = 6 (0x6), region = 95 }
 0x379   :  { %823 = vsyncpa [#allocation3], 1 }
 0x37a   :  { %825 = vsyncpa [#allocation3 + $0x1], 1 }
 0x37b   :  { %826 = vsyncpa [#allocation4], 1 }
 0x37c   :  { %828 = vsyncpa [#allocation4 + $0x1], 1 }

</bundles_post_ra>
